<compile_context>
chip_gen: v7x
topology: tpu7x:2x2x1
jax: 0.10.0
libtpu: 0.0.40
codegen_flags: <defaults>
</compile_context>

<pallas_src>
import functools

import jax
import jax.numpy as jnp
from jax.experimental import pallas as pl
from jax.experimental.pallas import tpu as pltpu

_EPS = 1e-5  # nn.BatchNorm2d default eps


def _basic_block_kernel(x_ref, b1_ref, g1_ref, be1_ref, b2_ref, g2_ref, be2_ref, o_ref,
                        *, H, W, C):
    # x_ref : (N*H, W*C)   packed activations, f32 (lane-dense: W*C multiple of 128 ideal)
    # b*_ref: (3*W*C, W*C) stacked band weight matrices (ky = 0,1,2 along K), bf16
    # g*/be*: (1, W*C)     BN gamma / beta pre-tiled across the packed lane axis, f32
    # o_ref : (N*H, W*C)   output, f32, lane-dense
    nh, wc = x_ref.shape
    inv_m = 1.0 / float(nh * W)  # 1 / (N*H*W) batch-stat normalizer

    x = x_ref[...]

    # Image-border masks for the vertical halo (built once, reused by both convs).
    row = jax.lax.broadcasted_iota(jnp.int32, (nh, wc), 0)
    has_above = (row % H) != 0          # row y-1 exists inside the same image
    has_below = (row % H) != (H - 1)    # row y+1 exists inside the same image

    def conv3x3(v_f32, band_ref):
        # Vertical halo on XLU/VPU: cyclic roll rows by +/-1 and zero across image borders.
        above = jnp.where(has_above, pltpu.roll(v_f32, shift=1, axis=0), 0.0)
        below = jnp.where(has_below, pltpu.roll(v_f32, shift=nh - 1, axis=0), 0.0)
        # One K = 3*W*C bf16 contraction (f32 accumulation): horizontal taps + channel
        # mixing live in the band matrix; the three kernel rows are stacked along K.
        lhs = jnp.concatenate([above.astype(jnp.bfloat16),
                               v_f32.astype(jnp.bfloat16),
                               below.astype(jnp.bfloat16)], axis=1)      # (NH, 3*WC)
        return jnp.dot(lhs, band_ref[...], preferred_element_type=jnp.float32)

    def channel_total(r):
        # r: (1, WC). Sum over the W x-positions inside the lane axis and broadcast the
        # per-channel total back to every x-position via a log2(W) cyclic roll tree (XLU).
        s = C
        while s < wc:
            r = r + pltpu.roll(r, shift=s, axis=1)
            s *= 2
        return r

    def batchnorm(acc, gamma_p, beta_p):
        # Training-mode BN (batch statistics, biased variance), two-pass centered form.
        mean = channel_total(jnp.sum(acc, axis=0, keepdims=True)) * inv_m          # (1, WC)
        centered = acc - mean
        var = channel_total(jnp.sum(centered * centered, axis=0, keepdims=True)) * inv_m
        scale = gamma_p * jax.lax.rsqrt(var + _EPS)                                 # (1, WC)
        return centered * scale + beta_p

    out1 = jnp.maximum(batchnorm(conv3x3(x, b1_ref), g1_ref[...], be1_ref[...]), 0.0)
    out2 = batchnorm(conv3x3(out1, b2_ref), g2_ref[...], be2_ref[...])
    # Residual add (downsample=None, stride=1) + final ReLU, all f32, lane-dense store.
    o_ref[...] = jnp.maximum(out2 + x, 0.0).astype(o_ref.dtype)


def _stacked_band_weights(w_oihw, W):
    """3x3 conv weight (O,I,3,3) -> (3*W*I, W*O) bf16 stacked band matrix.

    band_ky[x_in*I + ci, x_out*O + co] = w[co, ci, ky, kx] with kx = x_in - x_out + 1
    (zero outside the band -> implicit horizontal zero padding); the three ky bands are
    stacked along the contraction axis to match the [above | center | below] lane concat.
    """
    f32 = jnp.float32
    w_hwio = jnp.transpose(jnp.asarray(w_oihw, f32), (2, 3, 1, 0))  # (ky, kx, ci, co)
    bands = []
    for ky in range(3):
        blk = None
        for kx in range(3):
            term = jnp.kron(jnp.eye(W, k=1 - kx, dtype=f32), w_hwio[ky, kx])
            blk = term if blk is None else blk + term
        bands.append(blk)
    return jnp.concatenate(bands, axis=0).astype(jnp.bfloat16)


def prepare_block_params(w1_oihw, g1, b1, w2_oihw, g2, b2, W):
    """Pack weights/BN params once per weight set (hoisted out of the per-forward path)."""
    f32 = jnp.float32
    c1 = w1_oihw.shape[0]
    c2 = w2_oihw.shape[0]
    return {
        "band1": _stacked_band_weights(w1_oihw, W),
        "g1": jnp.tile(jnp.asarray(g1, f32).reshape(1, c1), (1, W)),
        "b1": jnp.tile(jnp.asarray(b1, f32).reshape(1, c1), (1, W)),
        "band2": _stacked_band_weights(w2_oihw, W),
        "g2": jnp.tile(jnp.asarray(g2, f32).reshape(1, c2), (1, W)),
        "b2": jnp.tile(jnp.asarray(b2, f32).reshape(1, c2), (1, W)),
    }


def basic_block_forward(x_nchw, params):
    """Pallas forward of MyBasicBlock (stride=1, downsample=None)."""
    N, C, H, W = x_nchw.shape
    NH, WC = N * H, W * C
    assert W & (W - 1) == 0, "roll-tree channel reduction needs power-of-two W"
    # TODO(synk): for non-power-of-two W fall back to a small (1,WC)x(WC,WC) averaging matmul.

    f32 = jnp.float32
    # NCHW -> lane-dense packed (N*H, W*C); column index = x*C + c.
    x_packed = jnp.transpose(x_nchw, (0, 2, 3, 1)).astype(f32).reshape(NH, WC)

    kernel = functools.partial(_basic_block_kernel, H=H, W=W, C=C)
    out2d = pl.pallas_call(
        kernel,
        out_shape=jax.ShapeDtypeStruct((NH, WC), f32),
        in_specs=[pl.BlockSpec(memory_space=pltpu.MemorySpace.VMEM)] * 7,
        out_specs=pl.BlockSpec(memory_space=pltpu.MemorySpace.VMEM),
    )(x_packed, params["band1"], params["g1"], params["b1"],
      params["band2"], params["g2"], params["b2"])

    # Unpack lane-dense slab back to NCHW (layout plumbing only).
    return jnp.transpose(out2d.reshape(N, H, W, C), (0, 3, 1, 2))


def my_basic_block(x_nchw, w1, g1, b1, w2, g2, b2):
    """One-shot convenience wrapper (packs weights, then runs the forward)."""
    params = prepare_block_params(w1, g1, b1, w2, g2, b2, x_nchw.shape[3])
    return basic_block_forward(x_nchw, params)


def _reference(x_nchw, w1, g1, b1, w2, g2, b2):
    """Pure-JAX f32 reference mirroring the PyTorch forward (training-mode BN, batch stats)."""
    def conv(x, w):
        return jax.lax.conv_general_dilated(
            x, w, window_strides=(1, 1), padding=((1, 1), (1, 1)),
            dimension_numbers=("NCHW", "OIHW", "NCHW"))

    def bn(x, g, b):
        m = jnp.mean(x, axis=(0, 2, 3), keepdims=True)
        v = jnp.mean((x - m) ** 2, axis=(0, 2, 3), keepdims=True)
        return (x - m) * jax.lax.rsqrt(v + _EPS) * g.reshape(1, -1, 1, 1) + b.reshape(1, -1, 1, 1)

    out = jax.nn.relu(bn(conv(x_nchw, w1), g1, b1))
    out = bn(conv(out, w2), g2, b2)
    return jax.nn.relu(out + x_nchw)


if __name__ == "__main__":
    key = jax.random.PRNGKey(0)
    kx, kw1, kw2, kg1, kb1, kg2, kb2 = jax.random.split(key, 7)

    # inplanes = planes = 8, stride = 1, downsample = None; W*C = 16*8 = 128 (lane-dense).
    N, C, H, W = 2, 8, 16, 16
    x = jax.random.normal(kx, (N, C, H, W), jnp.float32)

    w1 = jax.random.normal(kw1, (C, C, 3, 3), jnp.float32) * 0.1   # OIHW, bias=False
    w2 = jax.random.normal(kw2, (C, C, 3, 3), jnp.float32) * 0.1   # OIHW, bias=False
    g1 = 1.0 + 0.1 * jax.random.normal(kg1, (C,), jnp.float32)
    b1 = 0.1 * jax.random.normal(kb1, (C,), jnp.float32)
    g2 = 1.0 + 0.1 * jax.random.normal(kg2, (C,), jnp.float32)
    b2 = 0.1 * jax.random.normal(kb2, (C,), jnp.float32)

    # Constant packing is done once per weight set, outside the jitted forward.
    params = prepare_block_params(w1, g1, b1, w2, g2, b2, W)
    fwd = jax.jit(basic_block_forward)

    out = jax.block_until_ready(fwd(x, params))

    ref = _reference(x, w1, g1, b1, w2, g2, b2)
    assert out.shape == (N, C, H, W)
    err = float(jnp.max(jnp.abs(out - ref)))
    # Conv operands run on the MXU in bf16 (f32 accumulation; BN stats / residual stay f32),
    # so compare against the pure-f32 reference at a bf16-appropriate tolerance.
    assert jnp.allclose(out, ref, atol=3e-2, rtol=3e-2), err

    print("KERNEL_OK")
</pallas_src>

<mosaic_0001>
module attributes {stable_mosaic.version = 11 : i64} {
  func.func @_basic_block_kernel(%arg0: memref<32x128xf32, #tpu.memory_space<vmem>>, %arg1: memref<384x128xbf16, #tpu.memory_space<vmem>>, %arg2: memref<1x128xf32, #tpu.memory_space<vmem>>, %arg3: memref<1x128xf32, #tpu.memory_space<vmem>>, %arg4: memref<384x128xbf16, #tpu.memory_space<vmem>>, %arg5: memref<1x128xf32, #tpu.memory_space<vmem>>, %arg6: memref<1x128xf32, #tpu.memory_space<vmem>>, %arg7: memref<32x128xf32, #tpu.memory_space<vmem>>) attributes {dimension_semantics = [], scalar_prefetch = 0 : i64, scratch_operands = 0 : i64, tpu.core_type = #tpu.core_type<tc>} {
    %c0 = arith.constant 0 : index
    %c0_0 = arith.constant 0 : index
    %0 = vector.load %arg0[%c0, %c0_0] : memref<32x128xf32, #tpu.memory_space<vmem>>, vector<32x128xf32>
    %1 = tpu.iota {dimensions = array<i32: 0>} : vector<32x128xi32>
    %c16_i32 = arith.constant 16 : i32
    %c0_i32 = arith.constant 0 : i32
    %2 = arith.cmpi eq, %c16_i32, %c0_i32 : i32
    %c1_i32 = arith.constant 1 : i32
    %3 = arith.select %2, %c1_i32, %c16_i32 : i32
    %4 = vector.broadcast %3 : i32 to vector<32x128xi32>
    %5 = arith.remsi %1, %4 : vector<32x128xi32>
    %c0_i32_1 = arith.constant 0 : i32
    %6 = vector.broadcast %c0_i32_1 : i32 to vector<32x128xi32>
    %7 = arith.cmpi ne, %5, %6 : vector<32x128xi32>
    %c0_i32_2 = arith.constant 0 : i32
    %8 = vector.broadcast %c0_i32_2 : i32 to vector<32x128xi32>
    %9 = arith.cmpi slt, %5, %8 : vector<32x128xi32>
    %c0_i32_3 = arith.constant 0 : i32
    %10 = arith.cmpi slt, %3, %c0_i32_3 : i32
    %11 = vector.broadcast %10 : i1 to vector<32x128xi1>
    %12 = vector.broadcast %11 : vector<32x128xi1> to vector<32x128xi1>
    %13 = arith.xori %9, %12 : vector<32x128xi1>
    %14 = arith.andi %13, %7 : vector<32x128xi1>
    %15 = vector.broadcast %3 : i32 to vector<32x128xi32>
    %16 = arith.addi %5, %15 : vector<32x128xi32>
    %17 = arith.select %14, %16, %5 : vector<32x128xi1>, vector<32x128xi32>
    %c0_i32_4 = arith.constant 0 : i32
    %18 = vector.broadcast %c0_i32_4 : i32 to vector<32x128xi32>
    %19 = arith.cmpi ne, %17, %18 : vector<32x128xi32>
    %c16_i32_5 = arith.constant 16 : i32
    %c0_i32_6 = arith.constant 0 : i32
    %20 = arith.cmpi eq, %c16_i32_5, %c0_i32_6 : i32
    %c1_i32_7 = arith.constant 1 : i32
    %21 = arith.select %20, %c1_i32_7, %c16_i32_5 : i32
    %22 = vector.broadcast %21 : i32 to vector<32x128xi32>
    %23 = arith.remsi %1, %22 : vector<32x128xi32>
    %c0_i32_8 = arith.constant 0 : i32
    %24 = vector.broadcast %c0_i32_8 : i32 to vector<32x128xi32>
    %25 = arith.cmpi ne, %23, %24 : vector<32x128xi32>
    %c0_i32_9 = arith.constant 0 : i32
    %26 = vector.broadcast %c0_i32_9 : i32 to vector<32x128xi32>
    %27 = arith.cmpi slt, %23, %26 : vector<32x128xi32>
    %c0_i32_10 = arith.constant 0 : i32
    %28 = arith.cmpi slt, %21, %c0_i32_10 : i32
    %29 = vector.broadcast %28 : i1 to vector<32x128xi1>
    %30 = vector.broadcast %29 : vector<32x128xi1> to vector<32x128xi1>
    %31 = arith.xori %27, %30 : vector<32x128xi1>
    %32 = arith.andi %31, %25 : vector<32x128xi1>
    %33 = vector.broadcast %21 : i32 to vector<32x128xi32>
    %34 = arith.addi %23, %33 : vector<32x128xi32>
    %35 = arith.select %32, %34, %23 : vector<32x128xi1>, vector<32x128xi32>
    %c15_i32 = arith.constant 15 : i32
    %36 = vector.broadcast %c15_i32 : i32 to vector<32x128xi32>
    %37 = arith.cmpi ne, %35, %36 : vector<32x128xi32>
    %c1_i32_11 = arith.constant 1 : i32
    %38 = tpu.dynamic_rotate %0 by %c1_i32_11 dim 0 : vector<32x128xf32>, i32 -> vector<32x128xf32>
    %cst = arith.constant 0.000000e+00 : f32
    %39 = vector.broadcast %cst : f32 to vector<32x128xf32>
    %40 = arith.select %19, %38, %39 : vector<32x128xi1>, vector<32x128xf32>
    %c31_i32 = arith.constant 31 : i32
    %41 = tpu.dynamic_rotate %0 by %c31_i32 dim 0 : vector<32x128xf32>, i32 -> vector<32x128xf32>
    %cst_12 = arith.constant 0.000000e+00 : f32
    %42 = vector.broadcast %cst_12 : f32 to vector<32x128xf32>
    %43 = arith.select %37, %41, %42 : vector<32x128xi1>, vector<32x128xf32>
    %44 = arith.truncf %40 : vector<32x128xf32> to vector<32x128xbf16>
    %45 = arith.truncf %0 : vector<32x128xf32> to vector<32x128xbf16>
    %46 = arith.truncf %43 : vector<32x128xf32> to vector<32x128xbf16>
    %47 = tpu.concatenate %44, %45, %46 in 1 : vector<32x128xbf16>, vector<32x128xbf16>, vector<32x128xbf16> -> vector<32x384xbf16>
    %c0_13 = arith.constant 0 : index
    %c0_14 = arith.constant 0 : index
    %48 = vector.load %arg1[%c0_13, %c0_14] : memref<384x128xbf16, #tpu.memory_space<vmem>>, vector<384x128xbf16>
    %cst_15 = arith.constant dense<0.000000e+00> : vector<32x128xf32>
    %49 = tpu.matmul %47, %48, %cst_15 {dimension_numbers = #tpu.dot_dimension_numbers<[1], [0], [0], [1], [0, 0, 1, 1], [], []>} : vector<32x384xbf16>, vector<384x128xbf16>, vector<32x128xf32> -> vector<32x128xf32>
    %c0_16 = arith.constant 0 : index
    %c0_17 = arith.constant 0 : index
    %50 = vector.load %arg2[%c0_16, %c0_17] : memref<1x128xf32, #tpu.memory_space<vmem>>, vector<1x128xf32>
    %c0_18 = arith.constant 0 : index
    %c0_19 = arith.constant 0 : index
    %51 = vector.load %arg3[%c0_18, %c0_19] : memref<1x128xf32, #tpu.memory_space<vmem>>, vector<1x128xf32>
    %cst_20 = arith.constant dense<0.000000e+00> : vector<128xf32>
    %52 = vector.multi_reduction <add>, %49, %cst_20 [0] : vector<32x128xf32> to vector<128xf32>
    %53 = vector.shape_cast %52 : vector<128xf32> to vector<1x128xf32>
    %c8_i32 = arith.constant 8 : i32
    %54 = tpu.dynamic_rotate %53 by %c8_i32 dim 1 : vector<1x128xf32>, i32 -> vector<1x128xf32>
    %55 = arith.addf %53, %54 : vector<1x128xf32>
    %c16_i32_21 = arith.constant 16 : i32
    %56 = tpu.dynamic_rotate %55 by %c16_i32_21 dim 1 : vector<1x128xf32>, i32 -> vector<1x128xf32>
    %57 = arith.addf %55, %56 : vector<1x128xf32>
    %c32_i32 = arith.constant 32 : i32
    %58 = tpu.dynamic_rotate %57 by %c32_i32 dim 1 : vector<1x128xf32>, i32 -> vector<1x128xf32>
    %59 = arith.addf %57, %58 : vector<1x128xf32>
    %c64_i32 = arith.constant 64 : i32
    %60 = tpu.dynamic_rotate %59 by %c64_i32 dim 1 : vector<1x128xf32>, i32 -> vector<1x128xf32>
    %61 = arith.addf %59, %60 : vector<1x128xf32>
    %cst_22 = arith.constant 0.001953125 : f32
    %62 = vector.broadcast %cst_22 : f32 to vector<1x128xf32>
    %63 = arith.mulf %61, %62 : vector<1x128xf32>
    %64 = vector.broadcast %63 : vector<1x128xf32> to vector<32x128xf32>
    %65 = arith.subf %49, %64 : vector<32x128xf32>
    %66 = arith.mulf %65, %65 : vector<32x128xf32>
    %cst_23 = arith.constant dense<0.000000e+00> : vector<128xf32>
    %67 = vector.multi_reduction <add>, %66, %cst_23 [0] : vector<32x128xf32> to vector<128xf32>
    %68 = vector.shape_cast %67 : vector<128xf32> to vector<1x128xf32>
    %c8_i32_24 = arith.constant 8 : i32
    %69 = tpu.dynamic_rotate %68 by %c8_i32_24 dim 1 : vector<1x128xf32>, i32 -> vector<1x128xf32>
    %70 = arith.addf %68, %69 : vector<1x128xf32>
    %c16_i32_25 = arith.constant 16 : i32
    %71 = tpu.dynamic_rotate %70 by %c16_i32_25 dim 1 : vector<1x128xf32>, i32 -> vector<1x128xf32>
    %72 = arith.addf %70, %71 : vector<1x128xf32>
    %c32_i32_26 = arith.constant 32 : i32
    %73 = tpu.dynamic_rotate %72 by %c32_i32_26 dim 1 : vector<1x128xf32>, i32 -> vector<1x128xf32>
    %74 = arith.addf %72, %73 : vector<1x128xf32>
    %c64_i32_27 = arith.constant 64 : i32
    %75 = tpu.dynamic_rotate %74 by %c64_i32_27 dim 1 : vector<1x128xf32>, i32 -> vector<1x128xf32>
    %76 = arith.addf %74, %75 : vector<1x128xf32>
    %cst_28 = arith.constant 0.001953125 : f32
    %77 = vector.broadcast %cst_28 : f32 to vector<1x128xf32>
    %78 = arith.mulf %76, %77 : vector<1x128xf32>
    %cst_29 = arith.constant 9.99999974E-6 : f32
    %79 = vector.broadcast %cst_29 : f32 to vector<1x128xf32>
    %80 = arith.addf %78, %79 : vector<1x128xf32>
    %81 = math.rsqrt %80 : vector<1x128xf32>
    %82 = arith.mulf %50, %81 : vector<1x128xf32>
    %83 = vector.broadcast %82 : vector<1x128xf32> to vector<32x128xf32>
    %84 = arith.mulf %65, %83 : vector<32x128xf32>
    %85 = vector.broadcast %51 : vector<1x128xf32> to vector<32x128xf32>
    %86 = arith.addf %84, %85 : vector<32x128xf32>
    %cst_30 = arith.constant 0.000000e+00 : f32
    %87 = vector.broadcast %cst_30 : f32 to vector<32x128xf32>
    %88 = arith.maximumf %86, %87 : vector<32x128xf32>
    %c1_i32_31 = arith.constant 1 : i32
    %89 = tpu.dynamic_rotate %88 by %c1_i32_31 dim 0 : vector<32x128xf32>, i32 -> vector<32x128xf32>
    %cst_32 = arith.constant 0.000000e+00 : f32
    %90 = vector.broadcast %cst_32 : f32 to vector<32x128xf32>
    %91 = arith.select %19, %89, %90 : vector<32x128xi1>, vector<32x128xf32>
    %c31_i32_33 = arith.constant 31 : i32
    %92 = tpu.dynamic_rotate %88 by %c31_i32_33 dim 0 : vector<32x128xf32>, i32 -> vector<32x128xf32>
    %cst_34 = arith.constant 0.000000e+00 : f32
    %93 = vector.broadcast %cst_34 : f32 to vector<32x128xf32>
    %94 = arith.select %37, %92, %93 : vector<32x128xi1>, vector<32x128xf32>
    %95 = arith.truncf %91 : vector<32x128xf32> to vector<32x128xbf16>
    %96 = arith.truncf %88 : vector<32x128xf32> to vector<32x128xbf16>
    %97 = arith.truncf %94 : vector<32x128xf32> to vector<32x128xbf16>
    %98 = tpu.concatenate %95, %96, %97 in 1 : vector<32x128xbf16>, vector<32x128xbf16>, vector<32x128xbf16> -> vector<32x384xbf16>
    %c0_35 = arith.constant 0 : index
    %c0_36 = arith.constant 0 : index
    %99 = vector.load %arg4[%c0_35, %c0_36] : memref<384x128xbf16, #tpu.memory_space<vmem>>, vector<384x128xbf16>
    %cst_37 = arith.constant dense<0.000000e+00> : vector<32x128xf32>
    %100 = tpu.matmul %98, %99, %cst_37 {dimension_numbers = #tpu.dot_dimension_numbers<[1], [0], [0], [1], [0, 0, 1, 1], [], []>} : vector<32x384xbf16>, vector<384x128xbf16>, vector<32x128xf32> -> vector<32x128xf32>
    %c0_38 = arith.constant 0 : index
    %c0_39 = arith.constant 0 : index
    %101 = vector.load %arg5[%c0_38, %c0_39] : memref<1x128xf32, #tpu.memory_space<vmem>>, vector<1x128xf32>
    %c0_40 = arith.constant 0 : index
    %c0_41 = arith.constant 0 : index
    %102 = vector.load %arg6[%c0_40, %c0_41] : memref<1x128xf32, #tpu.memory_space<vmem>>, vector<1x128xf32>
    %cst_42 = arith.constant dense<0.000000e+00> : vector<128xf32>
    %103 = vector.multi_reduction <add>, %100, %cst_42 [0] : vector<32x128xf32> to vector<128xf32>
    %104 = vector.shape_cast %103 : vector<128xf32> to vector<1x128xf32>
    %c8_i32_43 = arith.constant 8 : i32
    %105 = tpu.dynamic_rotate %104 by %c8_i32_43 dim 1 : vector<1x128xf32>, i32 -> vector<1x128xf32>
    %106 = arith.addf %104, %105 : vector<1x128xf32>
    %c16_i32_44 = arith.constant 16 : i32
    %107 = tpu.dynamic_rotate %106 by %c16_i32_44 dim 1 : vector<1x128xf32>, i32 -> vector<1x128xf32>
    %108 = arith.addf %106, %107 : vector<1x128xf32>
    %c32_i32_45 = arith.constant 32 : i32
    %109 = tpu.dynamic_rotate %108 by %c32_i32_45 dim 1 : vector<1x128xf32>, i32 -> vector<1x128xf32>
    %110 = arith.addf %108, %109 : vector<1x128xf32>
    %c64_i32_46 = arith.constant 64 : i32
    %111 = tpu.dynamic_rotate %110 by %c64_i32_46 dim 1 : vector<1x128xf32>, i32 -> vector<1x128xf32>
    %112 = arith.addf %110, %111 : vector<1x128xf32>
    %cst_47 = arith.constant 0.001953125 : f32
    %113 = vector.broadcast %cst_47 : f32 to vector<1x128xf32>
    %114 = arith.mulf %112, %113 : vector<1x128xf32>
    %115 = vector.broadcast %114 : vector<1x128xf32> to vector<32x128xf32>
    %116 = arith.subf %100, %115 : vector<32x128xf32>
    %117 = arith.mulf %116, %116 : vector<32x128xf32>
    %cst_48 = arith.constant dense<0.000000e+00> : vector<128xf32>
    %118 = vector.multi_reduction <add>, %117, %cst_48 [0] : vector<32x128xf32> to vector<128xf32>
    %119 = vector.shape_cast %118 : vector<128xf32> to vector<1x128xf32>
    %c8_i32_49 = arith.constant 8 : i32
    %120 = tpu.dynamic_rotate %119 by %c8_i32_49 dim 1 : vector<1x128xf32>, i32 -> vector<1x128xf32>
    %121 = arith.addf %119, %120 : vector<1x128xf32>
    %c16_i32_50 = arith.constant 16 : i32
    %122 = tpu.dynamic_rotate %121 by %c16_i32_50 dim 1 : vector<1x128xf32>, i32 -> vector<1x128xf32>
    %123 = arith.addf %121, %122 : vector<1x128xf32>
    %c32_i32_51 = arith.constant 32 : i32
    %124 = tpu.dynamic_rotate %123 by %c32_i32_51 dim 1 : vector<1x128xf32>, i32 -> vector<1x128xf32>
    %125 = arith.addf %123, %124 : vector<1x128xf32>
    %c64_i32_52 = arith.constant 64 : i32
    %126 = tpu.dynamic_rotate %125 by %c64_i32_52 dim 1 : vector<1x128xf32>, i32 -> vector<1x128xf32>
    %127 = arith.addf %125, %126 : vector<1x128xf32>
    %cst_53 = arith.constant 0.001953125 : f32
    %128 = vector.broadcast %cst_53 : f32 to vector<1x128xf32>
    %129 = arith.mulf %127, %128 : vector<1x128xf32>
    %cst_54 = arith.constant 9.99999974E-6 : f32
    %130 = vector.broadcast %cst_54 : f32 to vector<1x128xf32>
    %131 = arith.addf %129, %130 : vector<1x128xf32>
    %132 = math.rsqrt %131 : vector<1x128xf32>
    %133 = arith.mulf %101, %132 : vector<1x128xf32>
    %134 = vector.broadcast %133 : vector<1x128xf32> to vector<32x128xf32>
    %135 = arith.mulf %116, %134 : vector<32x128xf32>
    %136 = vector.broadcast %102 : vector<1x128xf32> to vector<32x128xf32>
    %137 = arith.addf %135, %136 : vector<32x128xf32>
    %138 = arith.addf %137, %0 : vector<32x128xf32>
    %cst_55 = arith.constant 0.000000e+00 : f32
    %139 = vector.broadcast %cst_55 : f32 to vector<32x128xf32>
    %140 = arith.maximumf %138, %139 : vector<32x128xf32>
    %c0_56 = arith.constant 0 : index
    %c0_57 = arith.constant 0 : index
    %141 = vector.load %arg7[%c0_56, %c0_57] : memref<32x128xf32, #tpu.memory_space<vmem>>, vector<32x128xf32>
    tpu.vector_store %arg7[%c0_56, %c0_57], %140 {strides = array<i32>} : memref<32x128xf32, #tpu.memory_space<vmem>>, vector<32x128xf32>,
    return
  }
}

</mosaic_0001>

<bundles_post_ra>
// kernel: basic_block_forward.1
= control target key start
LH: loop header
LB: loop body
LE: loop exit
PB: predicated region body
PF: predicated region fallthrough
CT: control target
= control target key end

     0   :  { %v31_v8 = vlaneseq  ;;  %vm1163_vm4 = vmmov 1   ;;  %s1166_s11 = smov 32   ;;  %s1167_s12 = smov 64   ;;  %s1537_s1 = inlined_call_operand.vmem [shape: bf16[384,128], index: 1, kind: input, shape index: {}]   ;;  %s1538_s0 = inlined_call_operand.vmem [shape: f32[32,128], index: 0, kind: input, shape index: {}]   ;;  %s1539_s4 = inlined_call_operand.vmem [shape: bf16[384,128], index: 4, kind: input, shape index: {}]   ;;  %s1540_s2 = inlined_call_operand.vmem [shape: f32[1,128], index: 2, kind: input, shape index: {}]   ;;  %s1541_s3 = inlined_call_operand.vmem [shape: f32[1,128], index: 3, kind: input, shape index: {}]   ;;  %s1542_s5 = inlined_call_operand.vmem [shape: f32[1,128], index: 5, kind: input, shape index: {}]   ;;  %s1543_s6 = inlined_call_operand.vmem [shape: f32[1,128], index: 6, kind: input, shape index: {}]   ;;  %s1544_s7 = inlined_call_operand.vmem [shape: f32[32,128], index: 7, kind: output, shape index: {}]  }
   0x1   :  { %v1111_v0 = vld [vmem:[%s1537_s1 + $0x40] sm:$0xff]   ;;  %v1114_v3 = vld [vmem:[%s1537_s1 + $0x48] sm:$0xff]   ;;  %v1117_v6 = vld [vmem:[%s1537_s1 + $0x50] sm:$0xff]  }
   0x2   :  { %v1112_v1 = vld [vmem:[%s1537_s1] sm:$0xff]   ;;  %990 = vmatprep.subr.bf16.mxu0 %v1111_v0  ;;  %v1115_v4 = vld [vmem:[%s1537_s1 + $0x8] sm:$0xff]   ;;  %v1118_v7 = vld [vmem:[%s1537_s1 + $0x10] sm:$0xff]   ;;  %v1244_v13 = vshrl.u32 %v31_v8, 7 }
   0x3   :  { %v1113_v2 = vld [vmem:[%s1537_s1 + $0x80] sm:$0xff]   ;;  %991 = vmatpush3.bf16.msra.mxu0 %v1112_v1  ;;  %v1116_v5 = vld [vmem:[%s1537_s1 + $0x88] sm:$0xff]   ;;  %v1119_v9 = vld [vmem:[%s1537_s1 + $0x90] sm:$0xff]  }
   0x4   :  { %1066 = vmatprep.subr.bf16.mxu1 %v1113_v2  ;;  %992 = vmatprep.subr.bf16.mxu0 %v1114_v3  ;;  %v1120_v10 = vld [vmem:[%s1537_s1 + $0x58] sm:$0xff]   ;;  %v1123_v14 = vld [vmem:[%s1537_s1 + $0x60] sm:$0xff]   ;;  %v33_v17 = vadd.s32 8, %v1244_v13  ;;  %v1126_v18 = vld [vmem:[%s1537_s1 + $0x68] sm:$0xff]   ;;  %v35_v23 = vadd.s32 24, %v1244_v13  ;;  %v40_v26 = vand.u32 15, %v1244_v13 }
   0x5   :  { %1067 = vmatpush3.bf16.msra.mxu1 %v1113_v2  ;;  %v1121_v11 = vld [vmem:[%s1537_s1 + $0x18] sm:$0xff]   ;;  %v1125_v15 = vld [vmem:[%s1537_s1 + $0xa0] sm:$0xff]   ;;  %v1128_v19 = vld [vmem:[%s1537_s1 + $0xa8] sm:$0xff]   ;;  %vm96_vm0 = vcmp.lt.s32.totalorder %v1244_v13, 1  ;;  %vm109_vm2 = vcmp.lt.s32.totalorder %v1244_v13, 7  ;;  %v34_v49 = vadd.s32 16, %v1244_v13 }
   0x6   :  { %1068 = vmatprep.subr.bf16.mxu1 %v1116_v5  ;;  %v1122_v12 = vld [vmem:[%s1537_s1 + $0x98] sm:$0xff]   ;;  %v1124_v16 = vld [vmem:[%s1537_s1 + $0x20] sm:$0xff]   ;;  %v1127_v20 = vld [vmem:[%s1537_s1 + $0x28] sm:$0xff]   ;;  %v47_v21 = vand.u32 15, %v33_v17  ;;  %v61_v32 = vand.u32 15, %v35_v23  ;;  %vm84_vm3 = vcmp.ne.s32.totalorder %v40_v26, 0 }
   0x7   :  { %993 = vmatpush3.bf16.msra.mxu0 %v1115_v4  ;;  %v1129_v22 = vld [vmem:[%s1537_s1 + $0x70] sm:$0xff]   ;;  %v1132_v27 = vld [vmem:[%s1537_s1 + $0x78] sm:$0xff]   ;;  %v1283_v28 = vld [vmem:[%s1538_s0] sm:$0xff]  ;;  %v54_v58 = vand.u32 15, %v34_v49 }
   0x8   :  { %994 = vmatprep.subr.bf16.mxu0 %v1117_v6  ;;  %v1130_v24 = vld [vmem:[%s1537_s1 + $0x30] sm:$0xff]   ;;  %v1288_v29 = vld [vmem:[%s1538_s0 + $0x8] sm:$0xff]  ;;  %v1293_v30 = vld [vmem:[%s1538_s0 + $0x18] sm:$0xff]  ;;  %vm1295_vm1 = vcmp.ne.s32.totalorder %v47_v21, 15  ;;  %v92_v33 = vrot.slane %v1283_v28, 7  ;;  %v105_v39 = vrot.slane %v1283_v28, 1 }
   0x9   :  { %1069 = vmatpush3.bf16.msra.mxu1 %v1116_v5  ;;  %v1131_v25 = vld [vmem:[%s1537_s1 + $0xb0] sm:$0xff]   ;;  %v93_v34 = vrot.slane %v1288_v29, 7  ;;  %v120_v35 = vpack.c.bf16 %v1288_v29, %v1283_v28  ;;  %v95_v36 = vrot.slane %v1293_v30, 7  ;;  %v1134_v38 = vld [vmem:[%s1537_s1 + $0xb8] sm:$0xff]   ;;  %v106_v40 = vrot.slane %v1288_v29, 1  ;;  %vm1331_vm5 = vmpackc.low %vm1295_vm1, %vm1163_vm4 }
   0xa   :  { %1070 = vmatprep.subr.bf16.mxu1 %v1119_v9  ;;  %v1308_v37 = vld [vmem:[%s1538_s0 + $0x10] sm:$0xff]  ;;  %v108_v42 = vrot.slane %v1293_v30, 1  ;;  %v1133_v43 = vld [vmem:[%s1537_s1 + $0x38] sm:$0xff]   ;;  %vm91_vm6 = vcmp.ne.s32.totalorder %v61_v32, 15  ;;  %vm1341_vm7 = vmpackc.low %vm1163_vm4, %vm84_vm3  ;;  %vm86_vm9 = vcmp.ne.s32.totalorder %v54_v58, 0  ;;  %s1164_s0 = smov 8  }
   0xb   :  { %995 = vmatpush3.bf16.msra.mxu0 %v1118_v7  ;;  %v107_v41 = vrot.slane %v1308_v37, 1  ;;  %348 = vmatprep.mubr.bf16.mxu0 %v120_v35  ;;  %v99_v44 = vsel %vm96_vm0, %v92_v33, %v93_v34  ;;  %v100_v45 = vsel %vm96_vm0, %v95_v36, %v92_v33  ;;  %v112_v47 = vsel %vm109_vm2, %v105_v39, %v106_v40  ;;  %vm1351_vm8 = vmpackc.low %vm91_vm6, %vm1163_vm4  ;;  %s1165_s1 = smov 16  }
   0xc   :  { %996 = vmatprep.subr.bf16.mxu0 %v1120_v10  ;;  %v113_v52 = vsel %vm109_vm2, %v108_v42, %v105_v39  ;;  %v941_v53 = vpack.c.bf16 %v99_v44, %v100_v45  ;;  %v121_v55 = vpack.c.bf16 %v1293_v30, %v1308_v37  ;;  %v94_v56 = vrot.slane %v1308_v37, 7  ;;  %vm1364_vm10 = vmpackc.low %vm1163_vm4, %vm86_vm9 }
   0xd   :  { %1071 = vmatpush3.bf16.msra.mxu1 %v1119_v9  ;;  %v111_v46 = vsel %vm109_vm2, %v106_v40, %v107_v41  ;;  %v110_v51 = vsel %vm109_vm2, %v107_v41, %v108_v42  ;;  %v1375_v41 = vsub.s32 0, %v1244_v13 }
   0xe   :  { %1072 = vmatprep.subr.bf16.mxu1 %v1122_v12  ;;  %v947_v50 = vpack.c.bf16 %v111_v46, %v112_v47  ;;  %v950_v57 = vpack.c.bf16 %v113_v52, %v110_v51  ;;  %v97_v60 = vsel %vm96_vm0, %v94_v56, %v95_v36  ;;  %v98_v61 = vsel %vm96_vm0, %v93_v34, %v94_v56 }
   0xf   :  { %997 = vmatpush3.bf16.msra.mxu0 %v1121_v11  ;;  %v944_v62 = vpack.c.bf16 %v97_v60, %v98_v61 }
  0x10   :  { %998 = vmatprep.subr.bf16.mxu0 %v1123_v14  ;;  %1082 = vmatprep.mubr.msk.bf16.mxu1 %vm1331_vm5, %v947_v50 }
  0x11   :  { %1073 = vmatpush3.bf16.msra.mxu1 %v1122_v12 }
  0x12   :  { %1074 = vmatprep.subr.bf16.mxu1 %v1125_v15 }
  0x13   :  { %999 = vmatpush3.bf16.msra.mxu0 %v1124_v16 }
  0x14   :  { %1000 = vmatprep.subr.bf16.mxu0 %v1126_v18 }
  0x15   :  { %1075 = vmatpush3.bf16.msra.mxu1 %v1125_v15 }
  0x16   :  { %1076 = vmatprep.subr.bf16.mxu1 %v1128_v19 }
  0x17   :  { %1001 = vmatpush3.bf16.msra.mxu0 %v1127_v20 }
  0x18   :  { %1002 = vmatprep.subr.bf16.mxu0 %v1129_v22 }
  0x19   :  { %1077 = vmatpush3.bf16.msra.mxu1 %v1128_v19 }
  0x1a   :  { %1078 = vmatprep.subr.bf16.mxu1 %v1131_v25 }
  0x1b   :  { %1003 = vmatpush3.bf16.msra.mxu0 %v1130_v24 }
  0x1c   :  { %1004 = vmatprep.subr.bf16.mxu0 %v1132_v27 }
  0x1d   :  { %1079 = vmatpush3.bf16.msra.mxu1 %v1131_v25 }
  0x1e   :  { %1080 = vmatprep.subr.bf16.mxu1 %v1134_v38 }
  0x1f   :  { %1005 = vmatpush3.bf16.msra.mxu0 %v1133_v43 }
  0x21   :  { %1081 = vmatpush3.bf16.msra.mxu1 %v1134_v38 }
  0x22   :  { %942 = vmatmul.mubr.msk.bf16.vlgmr.msra.gmra.mrb[0].mxu0 %vm1341_vm7, %v941_v53 }
  0x23   :  { %356 = vmatprep.mubr.bf16.mxu0 %v121_v55 }
  0x24   :  { %1083 = vmatmul.mubr.msk.bf16.vlgmr.msra.gmra.mrb[0].mxu1 %vm1351_vm8, %v950_v57 }
  0x2a   :  { %945 = vmatmul.mubr.msk.bf16.gmra.mrb[4].mxu0 %vm1364_vm10, %v944_v62 }
  0xf5   :  { %v1006_v0 = vpop.f32.mrb[0].mxu0 }
  0xf6   :  { %v1007_v1 = vpop.f32.mrb[1].mxu0 }
  0xf7   :  { %v1008_v2 = vadd.f32 %v1007_v1, %v1006_v0  ;;  %v1009_v3 = vpop.f32.mrb[2].mxu0  ;;  %v1084_v4 = vpop.f32.mrb[0].mxu1 }
  0xf8   :  { %v1010_v5 = vpop.f32.mrb[3].mxu0  ;;  %v399_v6 = vpop.f32.mrb[1].mxu1 }
  0xf9   :  { %v1011_v7 = vadd.f32 %v1010_v5, %v1009_v3  ;;  %v400_v8 = vadd.f32 %v1008_v2, %v399_v6  ;;  %v1085_v9 = vpop.f32.mrb[2].mxu1  ;;  %v1135_v6 = vld [vmem:[%s1539_s4 + $0x40] sm:$0xff]  }
  0xfa   :  { %v402_v10 = vpop.f32.mrb[3].mxu1  ;;  %1028 = vmatprep.subr.bf16.mxu0 %v1135_v6 }
  0xfb   :  { %v403_v11 = vadd.f32 %v1011_v7, %v402_v10  ;;  %v1136_v7 = vld [vmem:[%s1539_s4] sm:$0xff]   ;;  %v1139_v10 = vld [vmem:[%s1539_s4 + $0x8] sm:$0xff]  }
  0xfc   :  { %1029 = vmatpush3.bf16.msra.mxu0 %v1136_v7 }
  0xfd   :  { %v1012_v12 = vpop.f32.mrb[4].mxu0  ;;  %v416_v18 = vadd.f32 %v403_v11, %v400_v8 }
  0xfe   :  { %v1013_v14 = vpop.f32.mrb[5].mxu0 }
  0xff   :  { %v1014_v15 = vadd.f32 %v1013_v14, %v1012_v12  ;;  %v1015_v16 = vpop.f32.mrb[6].mxu0  ;;  %v1141_v12 = vld [vmem:[%s1539_s4 + $0x50] sm:$0xff]  }
 0x100   :  { %v1016_v17 = vpop.f32.mrb[7].mxu0  ;;  %v1142_v14 = vld [vmem:[%s1539_s4 + $0x10] sm:$0xff]  }
 0x101   :  { %v408_v19 = vadd.f32 %v1084_v4, %v1014_v15  ;;  %v1017_v20 = vadd.f32 %v1016_v17, %v1015_v16  ;;  %v1143_v15 = vld [vmem:[%s1539_s4 + $0x90] sm:$0xff]   ;;  %v1144_v17 = vld [vmem:[%s1539_s4 + $0x58] sm:$0xff]  }
 0x103   :  { %v417_v21 = vadd.f32 %v416_v18, %v408_v19  ;;  %v411_v22 = vadd.f32 %v1085_v9, %v1017_v20  ;;  %v1138_v9 = vld [vmem:[%s1539_s4 + $0x48] sm:$0xff]   ;;  %v1146_v20 = vld [vmem:[%s1539_s4 + $0x98] sm:$0xff]  }
 0x104   :  { %1030 = vmatprep.subr.bf16.mxu0 %v1138_v9 }
 0x105   :  { %v418_v23 = vadd.f32 %v417_v21, %v411_v22  ;;  %1031 = vmatpush3.bf16.msra.mxu0 %v1139_v10  ;;  %v1147_v21 = vld [vmem:[%s1539_s4 + $0x60] sm:$0xff]  }
 0x106   :  { %1032 = vmatprep.subr.bf16.mxu0 %v1141_v12 }
 0x107   :  { %v419_v24 = vrot.slane %v418_v23, 4 }
 0x109   :  { %v420_v25 = vadd.f32 %v419_v24, %v418_v23  ;;  %1033 = vmatpush3.bf16.msra.mxu0 %v1142_v14  ;;  %v1149_v23 = vld [vmem:[%s1539_s4 + $0xa0] sm:$0xff]   ;;  %v1150_v24 = vld [vmem:[%s1539_s4 + $0x68] sm:$0xff]  }
 0x10a   :  { %1034 = vmatprep.subr.bf16.mxu0 %v1144_v17 }
 0x10b   :  { %v421_v26 = vrot.slane %v420_v25, 2 }
 0x10d   :  { %v422_v27 = vadd.f32 %v421_v26, %v420_v25  ;;  %v1151_v25 = vld [vmem:[%s1539_s4 + $0x28] sm:$0xff]  }
 0x10e   :  { %v1152_v26 = vld [vmem:[%s1539_s4 + $0xa8] sm:$0xff]  }
 0x10f   :  { %v423_v31 = vrot.slane %v422_v27, 1 }
 0x111   :  { %v424_v32 = vadd.f32 %v423_v31, %v422_v27  ;;  %v1153_v27 = vld [vmem:[%s1539_s4 + $0x70] sm:$0xff]  }
 0x112   :  { %v1155_v31 = vld [vmem:[%s1539_s4 + $0xb0] sm:$0xff]  }
 0x113   :  { %425 = vrot.lane.b32.xlu0 %v424_v32, %s1164_s0 }
 0x185   :  { %v426_v33 = vpop.permute.xlu0 %425 }
 0x186   :  { %v427_v34 = vadd.f32 %v426_v33, %v424_v32  ;;  %v1154_v32 = vld [vmem:[%s1539_s4 + $0x30] sm:$0xff]   ;;  %v1156_v33 = vld [vmem:[%s1539_s4 + $0x78] sm:$0xff]  }
 0x188   :  { %428 = vrot.lane.b32.xlu0 %v427_v34, %s1165_s1 }
 0x1fa   :  { %v429_v35 = vpop.permute.xlu0 %428 }
 0x1fb   :  { %v430_v36 = vadd.f32 %v429_v35, %v427_v34  ;;  %v1157_v34 = vld [vmem:[%s1539_s4 + $0x38] sm:$0xff]  }
 0x1fc   :  { %v1158_v35 = vld [vmem:[%s1539_s4 + $0xb8] sm:$0xff]  }
 0x1fd   :  { %431 = vrot.lane.b32.xlu1 %v430_v36, %s1166_s11 }
 0x26f   :  { %v432_v38 = vpop.permute.xlu1 %431 }
 0x270   :  { %v433_v39 = vadd.f32 %v432_v38, %v430_v36 }
 0x272   :  { %434 = vrot.lane.b32.xlu1 %v433_v39, %s1167_s12 }
 0x2e4   :  { %v435_v40 = vpop.permute.xlu1 %434 }
 0x2e5   :  { %v436_v42 = vadd.f32 %v435_v40, %v433_v39 }
 0x2e7   :  { %v437_v43 = vmul.f32 0.001953125, %v436_v42  ;;  %v414_v42 = vld [vmem:[%s1540_s2] sm:$0x1] }
 0x2e9   :  { %v441_v44 = vrot.slane %v437_v43, %v1375_v41 }
 0x2eb   :  { %v1378_v45 = vsub.f32 %v400_v8, %v441_v44  ;;  %v1380_v46 = vsub.f32 %v403_v11, %v441_v44  ;;  %v1382_v47 = vsub.f32 %v408_v19, %v441_v44  ;;  %v1384_v49 = vsub.f32 %v411_v22, %v441_v44  ;;  %v1137_v8 = vld [vmem:[%s1539_s4 + $0x80] sm:$0xff]   ;;  %v1140_v11 = vld [vmem:[%s1539_s4 + $0x88] sm:$0xff]   ;;  %v1145_v19 = vld [vmem:[%s1539_s4 + $0x18] sm:$0xff]  }
 0x2ec   :  { %1086 = vmatprep.subr.bf16.mxu1 %v1137_v8  ;;  %1035 = vmatpush3.bf16.msra.mxu0 %v1145_v19  ;;  %v1148_v22 = vld [vmem:[%s1539_s4 + $0x20] sm:$0xff]  }
 0x2ed   :  { %v446_v50 = vmul.f32 %v1378_v45, %v1378_v45  ;;  %v447_v51 = vmul.f32 %v1380_v46, %v1380_v46  ;;  %v448_v52 = vmul.f32 %v1382_v47, %v1382_v47  ;;  %v449_v55 = vmul.f32 %v1384_v49, %v1384_v49  ;;  %1087 = vmatpush3.bf16.msra.mxu1 %v1137_v8 }
 0x2ee   :  { %1088 = vmatprep.subr.bf16.mxu1 %v1140_v11  ;;  %1036 = vmatprep.subr.bf16.mxu0 %v1147_v21 }
 0x2ef   :  { %v450_v53 = vadd.f32 %v447_v51, %v446_v50  ;;  %v952_v51 = vld [vmem:[%s1541_s3] ss:$0 sm:$0xff] }
 0x2f0   :  { %1037 = vmatpush3.bf16.msra.mxu0 %v1148_v22 }
 0x2f1   :  { %v451_v56 = vadd.f32 %v450_v53, %v448_v52  ;;  %1089 = vmatpush3.bf16.msra.mxu1 %v1140_v11  ;;  %1038 = vmatprep.subr.bf16.mxu0 %v1150_v24 }
 0x2f2   :  { %1090 = vmatprep.subr.bf16.mxu1 %v1143_v15 }
 0x2f3   :  { %v452_v57 = vadd.f32 %v451_v56, %v449_v55 }
 0x2f4   :  { %1039 = vmatpush3.bf16.msra.mxu0 %v1151_v25 }
 0x2f5   :  { %v453_v58 = vrot.slane %v452_v57, 4  ;;  %1091 = vmatpush3.bf16.msra.mxu1 %v1143_v15  ;;  %1040 = vmatprep.subr.bf16.mxu0 %v1153_v27 }
 0x2f6   :  { %1092 = vmatprep.subr.bf16.mxu1 %v1146_v20 }
 0x2f7   :  { %v454_v60 = vadd.f32 %v453_v58, %v452_v57 }
 0x2f8   :  { %1041 = vmatpush3.bf16.msra.mxu0 %v1154_v32 }
 0x2f9   :  { %v455_v61 = vrot.slane %v454_v60, 2  ;;  %1093 = vmatpush3.bf16.msra.mxu1 %v1146_v20  ;;  %1042 = vmatprep.subr.bf16.mxu0 %v1156_v33 }
 0x2fa   :  { %1094 = vmatprep.subr.bf16.mxu1 %v1149_v23 }
 0x2fb   :  { %v456_v62 = vadd.f32 %v455_v61, %v454_v60 }
 0x2fc   :  { %1043 = vmatpush3.bf16.msra.mxu0 %v1157_v34 }
 0x2fd   :  { %v457_v0 = vrot.slane %v456_v62, 1  ;;  %1095 = vmatpush3.bf16.msra.mxu1 %v1149_v23 }
 0x2fe   :  { %1096 = vmatprep.subr.bf16.mxu1 %v1152_v26 }
 0x2ff   :  { %v458_v1 = vadd.f32 %v457_v0, %v456_v62 }
 0x301   :  { %459 = vrot.lane.b32.xlu0 %v458_v1, %s1164_s0  ;;  %1097 = vmatpush3.bf16.msra.mxu1 %v1152_v26 }
 0x302   :  { %1098 = vmatprep.subr.bf16.mxu1 %v1155_v31 }
 0x305   :  { %1099 = vmatpush3.bf16.msra.mxu1 %v1155_v31 }
 0x306   :  { %1100 = vmatprep.subr.bf16.mxu1 %v1158_v35 }
 0x309   :  { %1101 = vmatpush3.bf16.msra.mxu1 %v1158_v35 }
 0x373   :  { %v460_v2 = vpop.permute.xlu0 %459 }
 0x374   :  { %v461_v3 = vadd.f32 %v460_v2, %v458_v1 }
 0x376   :  { %462 = vrot.lane.b32.xlu1 %v461_v3, %s1165_s1 }
 0x3e8   :  { %v463_v4 = vpop.permute.xlu1 %462 }
 0x3e9   :  { %v464_v5 = vadd.f32 %v463_v4, %v461_v3 }
 0x3eb   :  { %465 = vrot.lane.b32.xlu0 %v464_v5, %s1166_s11 }
 0x45d   :  { %v466_v16 = vpop.permute.xlu0 %465 }
 0x45e   :  { %v467_v18 = vadd.f32 %v466_v16, %v464_v5 }
 0x460   :  { %468 = vrot.lane.b32.xlu1 %v467_v18, %s1167_s12 }
 0x4d2   :  { %v469_v36 = vpop.permute.xlu1 %468 }
 0x4d3   :  { %v470_v38 = vadd.f32 %v469_v36, %v467_v18 }
 0x4d5   :  { %v471_v39 = vmul.f32 0.001953125, %v470_v38 }
 0x4d7   :  { %v472_v40 = vadd.f32 1e-05, %v471_v39 }
 0x4d9   :  { %1159 = vrsqrt.f32 %v472_v40 }
 0x4e3   :  { %v1160_v43 = vpop.eup %1159 }
 0x4e4   :  { %v474_v44 = vmul.f32 %v1160_v43, %v414_v42 }
 0x4e6   :  { %v479_v50 = vrot.slane %v474_v44, %v1375_v41 }
 0x4e8   :  { %v481_v52 = vmul.f32 %v479_v50, %v1378_v45  ;;  %v482_v53 = vmul.f32 %v479_v50, %v1380_v46  ;;  %v483_v55 = vmul.f32 %v479_v50, %v1382_v47  ;;  %v484_v56 = vmul.f32 %v479_v50, %v1384_v49 }
 0x4ea   :  { %v491_v57 = vadd.f32 %v952_v51, %v481_v52  ;;  %v492_v58 = vadd.f32 %v952_v51, %v482_v53  ;;  %v493_v60 = vadd.f32 %v952_v51, %v483_v55  ;;  %v494_v61 = vadd.f32 %v952_v51, %v484_v56 }
 0x4ec   :  { %v495_v62 = vmax.f32 %v491_v57, 0.0  ;;  %v496_v0 = vmax.f32 %v492_v58, 0.0  ;;  %v498_v1 = vmax.f32 %v494_v61, 0.0  ;;  %v497_v2 = vmax.f32 %v493_v60, 0.0 }
 0x4ee   :  { %v499_v3 = vrot.slane %v495_v62, 7  ;;  %v500_v4 = vrot.slane %v496_v0, 7  ;;  %v502_v5 = vrot.slane %v498_v1, 7  ;;  %v525_v6 = vpack.c.bf16 %v496_v0, %v495_v62 }
 0x4ef   :  { %v511_v7 = vrot.slane %v495_v62, 1  ;;  %v512_v45 = vrot.slane %v496_v0, 1  ;;  %v513_v8 = vrot.slane %v497_v2, 1  ;;  %v514_v49 = vrot.slane %v498_v1, 1 }
 0x4f0   :  { %v505_v46 = vsel %vm96_vm0, %v499_v3, %v500_v4  ;;  %v506_v47 = vsel %vm96_vm0, %v502_v5, %v499_v3  ;;  %753 = vmatprep.mubr.bf16.mxu0 %v525_v6  ;;  %v526_v12 = vpack.c.bf16 %v498_v1, %v497_v2  ;;  %v501_v17 = vrot.slane %v497_v2, 7 }
 0x4f1   :  { %v978_v9 = vpack.c.bf16 %v505_v46, %v506_v47  ;;  %v516_v10 = vsel %vm109_vm2, %v512_v45, %v513_v8  ;;  %v517_v11 = vsel %vm109_vm2, %v511_v7, %v512_v45  ;;  %v515_v15 = vsel %vm109_vm2, %v513_v8, %v514_v49 }
 0x4f2   :  { %v984_v14 = vpack.c.bf16 %v516_v10, %v517_v11  ;;  %v518_v16 = vsel %vm109_vm2, %v514_v49, %v511_v7  ;;  %v503_v19 = vsel %vm96_vm0, %v501_v17, %v502_v5  ;;  %v504_v20 = vsel %vm96_vm0, %v500_v4, %v501_v17 }
 0x4f3   :  { %979 = vmatmul.mubr.msk.bf16.vlgmr.msra.gmra.mrb[8].mxu0 %vm1341_vm7, %v978_v9  ;;  %v987_v18 = vpack.c.bf16 %v518_v16, %v515_v15  ;;  %v981_v21 = vpack.c.bf16 %v503_v19, %v504_v20 }
 0x4f4   :  { %1102 = vmatprep.mubr.msk.bf16.mxu1 %vm1331_vm5, %v984_v14  ;;  %761 = vmatprep.mubr.bf16.mxu0 %v526_v12 }
 0x4f5   :  { %1103 = vmatmul.mubr.msk.bf16.vlgmr.msra.gmra.mrb[4].mxu1 %vm1351_vm8, %v987_v18 }
 0x4fb   :  { %982 = vmatmul.mubr.msk.bf16.gmra.mrb[12].mxu0 %vm1364_vm10, %v981_v21 }
 0x5c6   :  { %v1044_v54 = vpop.f32.mrb[8].mxu0 }
 0x5c7   :  { %v1045_v22 = vpop.f32.mrb[9].mxu0 }
 0x5c8   :  { %v1046_v23 = vadd.f32 %v1045_v22, %v1044_v54  ;;  %v1104_v24 = vpop.f32.mrb[4].mxu1  ;;  %v1047_v48 = vpop.f32.mrb[10].mxu0 }
 0x5c9   :  { %v804_v25 = vpop.f32.mrb[5].mxu1  ;;  %v1048_v26 = vpop.f32.mrb[11].mxu0 }
 0x5ca   :  { %v805_v27 = vadd.f32 %v1046_v23, %v804_v25  ;;  %v1049_v59 = vadd.f32 %v1048_v26, %v1047_v48  ;;  %v1105_v31 = vpop.f32.mrb[6].mxu1 }
 0x5cb   :  { %v807_v32 = vpop.f32.mrb[7].mxu1 }
 0x5cc   :  { %v808_v33 = vadd.f32 %v1049_v59, %v807_v32 }
 0x5ce   :  { %v1050_v34 = vpop.f32.mrb[12].mxu0  ;;  %v821_v39 = vadd.f32 %v808_v33, %v805_v27 }
 0x5cf   :  { %v1051_v35 = vpop.f32.mrb[13].mxu0 }
 0x5d0   :  { %v1052_v13 = vadd.f32 %v1051_v35, %v1050_v34  ;;  %v1053_v36 = vpop.f32.mrb[14].mxu0 }
 0x5d1   :  { %v1054_v38 = vpop.f32.mrb[15].mxu0 }
 0x5d2   :  { %v813_v63 = vadd.f32 %v1104_v24, %v1052_v13  ;;  %v1055_v40 = vadd.f32 %v1054_v38, %v1053_v36 }
 0x5d4   :  { %v822_v42 = vadd.f32 %v821_v39, %v813_v63  ;;  %v816_v43 = vadd.f32 %v1105_v31, %v1055_v40 }
 0x5d6   :  { %v823_v44 = vadd.f32 %v822_v42, %v816_v43 }
 0x5d8   :  { %v824_v50 = vrot.slane %v823_v44, 4 }
 0x5da   :  { %v825_v51 = vadd.f32 %v824_v50, %v823_v44 }
 0x5dc   :  { %v826_v52 = vrot.slane %v825_v51, 2 }
 0x5de   :  { %v827_v53 = vadd.f32 %v826_v52, %v825_v51 }
 0x5e0   :  { %v828_v55 = vrot.slane %v827_v53, 1 }
 0x5e2   :  { %v829_v56 = vadd.f32 %v828_v55, %v827_v53 }
 0x5e4   :  { %830 = vrot.lane.b32.xlu0 %v829_v56, %s1164_s0 }
 0x656   :  { %v831_v57 = vpop.permute.xlu0 %830 }
 0x657   :  { %v832_v58 = vadd.f32 %v831_v57, %v829_v56 }
 0x659   :  { %833 = vrot.lane.b32.xlu1 %v832_v58, %s1165_s1 }
 0x6cb   :  { %v834_v60 = vpop.permute.xlu1 %833 }
 0x6cc   :  { %v835_v61 = vadd.f32 %v834_v60, %v832_v58 }
 0x6ce   :  { %836 = vrot.lane.b32.xlu0 %v835_v61, %s1166_s11 }
 0x740   :  { %v837_v62 = vpop.permute.xlu0 %836 }
 0x741   :  { %v838_v0 = vadd.f32 %v837_v62, %v835_v61 }
 0x743   :  { %839 = vrot.lane.b32.xlu1 %v838_v0, %s1167_s12 }
 0x7b5   :  { %v840_v1 = vpop.permute.xlu1 %839 }
 0x7b6   :  { %v841_v2 = vadd.f32 %v840_v1, %v838_v0 }
 0x7b8   :  { %v842_v3 = vmul.f32 0.001953125, %v841_v2 }
 0x7ba   :  { %v846_v4 = vrot.slane %v842_v3, %v1375_v41 }
 0x7bc   :  { %v847_v5 = vsub.f32 %v805_v27, %v846_v4  ;;  %v848_v6 = vsub.f32 %v808_v33, %v846_v4  ;;  %v849_v7 = vsub.f32 %v813_v63, %v846_v4  ;;  %v850_v45 = vsub.f32 %v816_v43, %v846_v4  ;;  %v819_v27 = vld [vmem:[%s1542_s5] sm:$0x1] }
 0x7bd   :  { %v989_v33 = vld [vmem:[%s1543_s6] ss:$0 sm:$0xff] }
 0x7be   :  { %v851_v8 = vmul.f32 %v847_v5, %v847_v5  ;;  %v852_v46 = vmul.f32 %v848_v6, %v848_v6  ;;  %v853_v47 = vmul.f32 %v849_v7, %v849_v7  ;;  %v854_v9 = vmul.f32 %v850_v45, %v850_v45 }
 0x7c0   :  { %v855_v49 = vadd.f32 %v852_v46, %v851_v8 }
 0x7c2   :  { %v856_v10 = vadd.f32 %v855_v49, %v853_v47 }
 0x7c4   :  { %v857_v11 = vadd.f32 %v856_v10, %v854_v9 }
 0x7c6   :  { %v858_v12 = vrot.slane %v857_v11, 4 }
 0x7c8   :  { %v859_v14 = vadd.f32 %v858_v12, %v857_v11 }
 0x7ca   :  { %v860_v15 = vrot.slane %v859_v14, 2 }
 0x7cc   :  { %v861_v16 = vadd.f32 %v860_v15, %v859_v14 }
 0x7ce   :  { %v862_v17 = vrot.slane %v861_v16, 1 }
 0x7d0   :  { %v863_v18 = vadd.f32 %v862_v17, %v861_v16 }
 0x7d2   :  { %864 = vrot.lane.b32.xlu0 %v863_v18, %s1164_s0 }
 0x844   :  { %v865_v19 = vpop.permute.xlu0 %864 }
 0x845   :  { %v866_v20 = vadd.f32 %v865_v19, %v863_v18 }
 0x847   :  { %867 = vrot.lane.b32.xlu1 %v866_v20, %s1165_s1 }
 0x8b9   :  { %v868_v21 = vpop.permute.xlu1 %867 }
 0x8ba   :  { %v869_v54 = vadd.f32 %v868_v21, %v866_v20 }
 0x8bc   :  { %870 = vrot.lane.b32.xlu0 %v869_v54, %s1166_s11 }
 0x92e   :  { %v871_v22 = vpop.permute.xlu0 %870 }
 0x92f   :  { %v872_v23 = vadd.f32 %v871_v22, %v869_v54 }
 0x931   :  { %873 = vrot.lane.b32.xlu1 %v872_v23, %s1167_s12 }
 0x9a3   :  { %v874_v24 = vpop.permute.xlu1 %873 }
 0x9a4   :  { %v875_v48 = vadd.f32 %v874_v24, %v872_v23 }
 0x9a6   :  { %v876_v25 = vmul.f32 0.001953125, %v875_v48 }
 0x9a8   :  { %v877_v26 = vadd.f32 1e-05, %v876_v25 }
 0x9aa   :  { %1161 = vrsqrt.f32 %v877_v26 }
 0x9b4   :  { %v1162_v59 = vpop.eup %1161 }
 0x9b5   :  { %v879_v31 = vmul.f32 %v1162_v59, %v819_v27 }
 0x9b7   :  { %v884_v32 = vrot.slane %v879_v31, %v1375_v41 }
 0x9b9   :  { %v886_v34 = vmul.f32 %v884_v32, %v847_v5  ;;  %v887_v35 = vmul.f32 %v884_v32, %v848_v6  ;;  %v888_v13 = vmul.f32 %v884_v32, %v849_v7  ;;  %v889_v36 = vmul.f32 %v884_v32, %v850_v45 }
 0x9bb   :  { %v896_v38 = vadd.f32 %v989_v33, %v886_v34  ;;  %v897_v39 = vadd.f32 %v989_v33, %v887_v35  ;;  %v898_v63 = vadd.f32 %v989_v33, %v888_v13  ;;  %v899_v40 = vadd.f32 %v989_v33, %v889_v36 }
 0x9bd   :  { %v900_v42 = vadd.f32 %v896_v38, %v1283_v28  ;;  %v901_v43 = vadd.f32 %v897_v39, %v1288_v29  ;;  %v902_v44 = vadd.f32 %v898_v63, %v1308_v37  ;;  %v903_v41 = vadd.f32 %v899_v40, %v1293_v30 }
 0x9bf   :  { %v904_v50 = vmax.f32 %v900_v42, 0.0  ;;  %v905_v51 = vmax.f32 %v901_v43, 0.0  ;;  %v906_v52 = vmax.f32 %v902_v44, 0.0  ;;  %v907_v53 = vmax.f32 %v903_v41, 0.0 }
 0x9c1   :  { %908 = vst [vmem:[%s1544_s7] sm:$0xff] %v904_v50  ;;  %909 = vst [vmem:[%s1544_s7 + $0x8] sm:$0xff] %v905_v51 }
 0x9c2   :  { %910 = vst [vmem:[%s1544_s7 + $0x10] sm:$0xff] %v906_v52  ;;  %911 = vst [vmem:[%s1544_s7 + $0x18] sm:$0xff] %v907_v53 }

</bundles_post_ra>
